<compile_context>
chip_gen: v7x
topology: tpu7x:2x2x1
jax: 0.10.0
libtpu: 0.0.40
codegen_flags: <defaults>
</compile_context>

<pallas_src>
import functools

import jax
import jax.numpy as jnp
from jax.experimental import pallas as pl
from jax.experimental.pallas import tpu as pltpu

BN_EPS = 1e-5
NEG_SLOPE = 0.2


def _round_up(a, b):
    return (a + b - 1) // b * b


def _vmem_limit_bytes():
    # v7x: 64 MiB physical VMEM; v5e/v6e: 128 MiB.  Leave headroom, cap at
    # 96 MiB on the big parts; fall back to a v7x-safe 48 MiB if the query
    # is unavailable.  (Per-step footprint here is <3 MiB, so this never binds.)
    try:
        cap = int(pltpu.get_tpu_info().vmem_capacity_bytes)
    except Exception:
        return 48 << 20
    return int(min(max(cap - (16 << 20), 32 << 20), 96 << 20))


def _stats_kernel(p_ref, w_ref, stats_ref):
    # Conv tile as matmul on the MXU (bf16 in, f32 accumulation); emit only
    # per-tile partial BN statistics -- Y is never written back to HBM.
    y = jnp.dot(p_ref[...], w_ref[...], preferred_element_type=jnp.float32)
    s1 = jnp.sum(y, axis=0, keepdims=True)        # per-channel sum
    s2 = jnp.sum(y * y, axis=0, keepdims=True)    # per-channel sum of squares
    pad = jnp.zeros((6, y.shape[1]), jnp.float32)
    stats_ref[...] = jnp.concatenate([s1, s2, pad], axis=0)   # one dense store


def _conv_bn_lrelu_kernel(p_ref, w_ref, prm_ref, o_ref):
    # Recompute the conv matmul (MXU has plenty of slack at K = Cin*9) and
    # apply the folded BN scale/shift + LeakyReLU in one fused pass.
    y = jnp.dot(p_ref[...], w_ref[...], preferred_element_type=jnp.float32)
    scale = prm_ref[0:1, :]   # row 0: gamma * rsqrt(var + eps)
    shift = prm_ref[1:2, :]   # row 1: beta - mean * scale
    z = y * scale + shift
    o_ref[...] = jnp.where(z >= 0, z, NEG_SLOPE * z).astype(o_ref.dtype)


def _im2col(x, kernel_size, stride):
    # x: [N, Cin, H, W]  ->  patches: [N*OH*OW, Cin*kh*kw]
    n, cin, h, w = x.shape
    kh = kw = kernel_size
    oh = (h - kh) // stride + 1
    ow = (w - kw) // stride + 1
    cols = []
    for i in range(kh):
        for j in range(kw):
            sl = x[:, :, i:i + stride * oh:stride, j:j + stride * ow:stride]
            cols.append(sl)  # [N, Cin, OH, OW]
    patches = jnp.stack(cols, axis=0).reshape(kh, kw, n, cin, oh, ow)
    patches = patches.transpose(2, 4, 5, 3, 0, 1)  # [N, OH, OW, Cin, kh, kw]
    return patches.reshape(n * oh * ow, cin * kh * kw), oh, ow


@functools.partial(jax.jit, static_argnames=("kernel_size", "stride", "block_m"))
def basic_conv_forward(x, conv_w, conv_b, bn_gamma, bn_beta,
                       kernel_size=3, stride=2, block_m=2048):
    # conv bias is mathematically cancelled by training-mode BatchNorm
    # (mean-subtraction removes any per-channel constant), so we drop it.
    # TODO(synk): re-add conv_b if this module is ever run in eval mode
    # (running statistics) -- the cancellation only holds for batch stats.
    del conv_b

    n, cin, h, w = x.shape
    cout = conv_w.shape[0]

    # TODO(synk): the 9x im2col expansion + NCHW<->NHWC transposes still run as
    # XLA ops in HBM; a fully fused version would gather the 9 strided taps
    # in-kernel from an NHWC input kept in memory_space=pl.ANY.
    patches, oh, ow = _im2col(x.astype(jnp.bfloat16), kernel_size, stride)
    m, k_dim = patches.shape

    cout_pad = _round_up(cout, 128)                          # lane-dense output
    tm = _round_up(min(block_m, _round_up(m, 256)), 256)     # MXU-tile aligned
    m_pad = _round_up(m, tm)
    n_tiles = m_pad // tm

    p_bf16 = jnp.pad(patches, ((0, m_pad - m), (0, 0)))      # already bf16
    w_mat = conv_w.reshape(cout, k_dim).T.astype(jnp.bfloat16)   # [K, Cout]
    w_pad = jnp.pad(w_mat, ((0, 0), (0, cout_pad - cout)))   # [K, 128*]

    vmem_limit = _vmem_limit_bytes()

    # ---- Pass 1: per-tile partial BN statistics (no Y writeback) -------------
    cost_stats = pl.CostEstimate(
        flops=2 * m_pad * k_dim * cout_pad + 3 * m_pad * cout_pad,
        transcendentals=0,
        bytes_accessed=(p_bf16.size * 2 + w_pad.size * 2
                        + n_tiles * 8 * cout_pad * 4),
    )
    stats = pl.pallas_call(
        _stats_kernel,
        out_shape=jax.ShapeDtypeStruct((n_tiles * 8, cout_pad), jnp.float32),
        grid_spec=pltpu.PrefetchScalarGridSpec(
            num_scalar_prefetch=0,
            grid=(n_tiles,),
            in_specs=[
                pl.BlockSpec((tm, k_dim), lambda i: (i, 0)),        # patch tile
                pl.BlockSpec((k_dim, cout_pad), lambda i: (0, 0)),  # resident W
            ],
            out_specs=pl.BlockSpec((8, cout_pad), lambda i: (i, 0)),  # partials
        ),
        compiler_params=pltpu.CompilerParams(
            dimension_semantics=("parallel",),   # independent tiles -> megacore
            vmem_limit_bytes=vmem_limit,
        ),
        cost_estimate=cost_stats,
    )(p_bf16, w_pad)

    # ---- Reduce partials & fold BN into per-channel scale/shift (tiny math) --
    total = jnp.sum(stats.reshape(n_tiles, 8, cout_pad), axis=0)  # f32 reduce
    inv_m = 1.0 / m                       # true (unpadded) sample count;
    mean = total[0] * inv_m               # zero-padded rows contribute 0.
    var = jnp.maximum(total[1] * inv_m - mean * mean, 0.0)        # biased var
    gamma_pad = jnp.pad(bn_gamma.astype(jnp.float32), (0, cout_pad - cout))
    beta_pad = jnp.pad(bn_beta.astype(jnp.float32), (0, cout_pad - cout))
    scale = gamma_pad * jax.lax.rsqrt(var + BN_EPS)
    shift = beta_pad - mean * scale
    params = jnp.zeros((8, cout_pad), jnp.float32)
    params = params.at[0].set(scale).at[1].set(shift)

    # ---- Pass 2: fused conv matmul + BN affine + LeakyReLU -------------------
    # TODO(synk): emit bf16 here (halves the final HBM write) if the downstream
    # consumer tolerates it; kept f32 to hold the 2e-3 comparison tolerance.
    cost_apply = pl.CostEstimate(
        flops=2 * m_pad * k_dim * cout_pad + 3 * m_pad * cout_pad,
        transcendentals=0,
        bytes_accessed=(p_bf16.size * 2 + w_pad.size * 2
                        + 8 * cout_pad * 4 + m_pad * cout_pad * 4),
    )
    out_flat = pl.pallas_call(
        _conv_bn_lrelu_kernel,
        out_shape=jax.ShapeDtypeStruct((m_pad, cout_pad), jnp.float32),
        grid_spec=pltpu.PrefetchScalarGridSpec(
            num_scalar_prefetch=0,
            grid=(n_tiles,),
            in_specs=[
                pl.BlockSpec((tm, k_dim), lambda i: (i, 0)),
                pl.BlockSpec((k_dim, cout_pad), lambda i: (0, 0)),
                pl.BlockSpec((8, cout_pad), lambda i: (0, 0)),
            ],
            out_specs=pl.BlockSpec((tm, cout_pad), lambda i: (i, 0)),
        ),
        compiler_params=pltpu.CompilerParams(
            dimension_semantics=("parallel",),
            vmem_limit_bytes=vmem_limit,
        ),
        cost_estimate=cost_apply,
    )(p_bf16, w_pad, params)

    # TODO(synk): returning NHWC would remove an extra HBM transpose pass; kept
    # NCHW to match the PyTorch module's output layout.
    return out_flat[:m, :cout].reshape(n, oh, ow, cout).transpose(0, 3, 1, 2)


def reference_forward(x, conv_w, conv_b, bn_gamma, bn_beta, stride=2):
    # Pure-JAX reference (training-mode BN). Inputs cast to bf16 for the conv
    # so the comparison matches the kernel's bf16 MXU path.
    y = jax.lax.conv_general_dilated(
        x.astype(jnp.bfloat16), conv_w.astype(jnp.bfloat16),
        window_strides=(stride, stride), padding="VALID",
        dimension_numbers=("NCHW", "OIHW", "NCHW"),
        preferred_element_type=jnp.float32,
    ) + conv_b[None, :, None, None]
    mean = jnp.mean(y, axis=(0, 2, 3), keepdims=True)
    var = jnp.mean((y - mean) ** 2, axis=(0, 2, 3), keepdims=True)
    z = (y - mean) * jax.lax.rsqrt(var + BN_EPS)
    z = z * bn_gamma[None, :, None, None] + bn_beta[None, :, None, None]
    return jnp.where(z >= 0, z, NEG_SLOPE * z)


if __name__ == "__main__":
    key = jax.random.PRNGKey(0)
    k_x, k_w, k_b = jax.random.split(key, 3)

    N, Cin, H, W = 2, 4, 16, 16
    Cout, KS, STRIDE = 8, 3, 2

    x = jax.random.normal(k_x, (N, Cin, H, W), dtype=jnp.float32)

    # Deterministic synthetic parameters (shapes per nn.Conv2d / nn.BatchNorm2d)
    fan_in = Cin * KS * KS
    bound = 1.0 / (fan_in ** 0.5)
    conv_w = jax.random.uniform(k_w, (Cout, Cin, KS, KS), jnp.float32, -bound, bound)
    conv_b = jax.random.uniform(k_b, (Cout,), jnp.float32, -bound, bound)
    bn_gamma = jnp.ones((Cout,), jnp.float32)   # BatchNorm2d default weight
    bn_beta = jnp.zeros((Cout,), jnp.float32)   # BatchNorm2d default bias

    out = basic_conv_forward(x, conv_w, conv_b, bn_gamma, bn_beta,
                             kernel_size=KS, stride=STRIDE)
    out = jax.block_until_ready(out)

    ref = reference_forward(x, conv_w, conv_b, bn_gamma, bn_beta, stride=STRIDE)
    assert out.shape == ref.shape == (N, Cout, 7, 7)
    assert jnp.allclose(out, ref, atol=2e-3, rtol=2e-3), \
        float(jnp.max(jnp.abs(out - ref)))

    print("KERNEL_OK")
</pallas_src>

<mosaic_0001>
module attributes {stable_mosaic.version = 11 : i64} {
  func.func @_stats_kernel(%arg0: i32, %arg1: memref<256x36xbf16, #tpu.memory_space<vmem>>, %arg2: memref<36x128xbf16, #tpu.memory_space<vmem>>, %arg3: memref<8x128xf32, #tpu.memory_space<vmem>>) attributes {dimension_semantics = [#tpu.dimension_semantics<parallel>], iteration_bounds = array<i64: 1>, scalar_prefetch = 0 : i64, scratch_operands = 0 : i64, tpu.core_type = #tpu.core_type<tc>, window_params = [{transform_indices = @transform_0, window_bounds = array<i64: 256, 36>}, {pipeline_mode = #tpu.pipeline_mode<synchronous>, transform_indices = @transform_1, window_bounds = array<i64: 36, 128>}, {transform_indices = @transform_2, window_bounds = array<i64: 8, 128>}]} {
    %c0 = arith.constant 0 : index
    %c0_0 = arith.constant 0 : index
    %0 = vector.load %arg1[%c0, %c0_0] : memref<256x36xbf16, #tpu.memory_space<vmem>>, vector<256x36xbf16>
    %c0_1 = arith.constant 0 : index
    %c0_2 = arith.constant 0 : index
    %1 = vector.load %arg2[%c0_1, %c0_2] : memref<36x128xbf16, #tpu.memory_space<vmem>>, vector<36x128xbf16>
    %cst = arith.constant dense<0.000000e+00> : vector<256x128xf32>
    %2 = tpu.matmul %0, %1, %cst {dimension_numbers = #tpu.dot_dimension_numbers<[1], [0], [0], [1], [0, 0, 1, 1], [], []>} : vector<256x36xbf16>, vector<36x128xbf16>, vector<256x128xf32> -> vector<256x128xf32>
    %cst_3 = arith.constant dense<0.000000e+00> : vector<128xf32>
    %3 = vector.multi_reduction <add>, %2, %cst_3 [0] : vector<256x128xf32> to vector<128xf32>
    %4 = vector.shape_cast %3 : vector<128xf32> to vector<1x128xf32>
    %5 = arith.mulf %2, %2 : vector<256x128xf32>
    %cst_4 = arith.constant dense<0.000000e+00> : vector<128xf32>
    %6 = vector.multi_reduction <add>, %5, %cst_4 [0] : vector<256x128xf32> to vector<128xf32>
    %7 = vector.shape_cast %6 : vector<128xf32> to vector<1x128xf32>
    %cst_5 = arith.constant 0.000000e+00 : f32
    %8 = vector.broadcast %cst_5 : f32 to vector<6x128xf32>
    %9 = tpu.concatenate %4, %7, %8 in 0 : vector<1x128xf32>, vector<1x128xf32>, vector<6x128xf32> -> vector<8x128xf32>
    %c0_6 = arith.constant 0 : index
    %c0_7 = arith.constant 0 : index
    %10 = vector.load %arg3[%c0_6, %c0_7] : memref<8x128xf32, #tpu.memory_space<vmem>>, vector<8x128xf32>
    tpu.vector_store %arg3[%c0_6, %c0_7], %9 {strides = array<i32>} : memref<8x128xf32, #tpu.memory_space<vmem>>, vector<8x128xf32>,
    return
  }
  func.func @transform_0(%arg0: i32) -> (i32, i32) {
    %c0_i32 = arith.constant 0 : i32
    %c0_i32_0 = arith.constant 0 : i32
    return %arg0, %c0_i32 : i32, i32
  }
  func.func @transform_1(%arg0: i32) -> (i32, i32) {
    %c0_i32 = arith.constant 0 : i32
    %c0_i32_0 = arith.constant 0 : i32
    %c0_i32_1 = arith.constant 0 : i32
    return %c0_i32, %c0_i32_0 : i32, i32
  }
  func.func @transform_2(%arg0: i32) -> (i32, i32) {
    %c0_i32 = arith.constant 0 : i32
    %c0_i32_0 = arith.constant 0 : i32
    return %arg0, %c0_i32 : i32, i32
  }
}

module attributes {stable_mosaic.version = 11 : i64} {
  func.func @_conv_bn_lrelu_kernel(%arg0: i32, %arg1: memref<256x36xbf16, #tpu.memory_space<vmem>>, %arg2: memref<36x128xbf16, #tpu.memory_space<vmem>>, %arg3: memref<8x128xf32, #tpu.memory_space<vmem>>, %arg4: memref<256x128xf32, #tpu.memory_space<vmem>>) attributes {dimension_semantics = [#tpu.dimension_semantics<parallel>], iteration_bounds = array<i64: 1>, scalar_prefetch = 0 : i64, scratch_operands = 0 : i64, tpu.core_type = #tpu.core_type<tc>, window_params = [{transform_indices = @transform_0, window_bounds = array<i64: 256, 36>}, {pipeline_mode = #tpu.pipeline_mode<synchronous>, transform_indices = @transform_1, window_bounds = array<i64: 36, 128>}, {pipeline_mode = #tpu.pipeline_mode<synchronous>, transform_indices = @transform_2, window_bounds = array<i64: 8, 128>}, {transform_indices = @transform_3, window_bounds = array<i64: 256, 128>}]} {
    %c0 = arith.constant 0 : index
    %c0_0 = arith.constant 0 : index
    %0 = vector.load %arg1[%c0, %c0_0] : memref<256x36xbf16, #tpu.memory_space<vmem>>, vector<256x36xbf16>
    %c0_1 = arith.constant 0 : index
    %c0_2 = arith.constant 0 : index
    %1 = vector.load %arg2[%c0_1, %c0_2] : memref<36x128xbf16, #tpu.memory_space<vmem>>, vector<36x128xbf16>
    %cst = arith.constant dense<0.000000e+00> : vector<256x128xf32>
    %2 = tpu.matmul %0, %1, %cst {dimension_numbers = #tpu.dot_dimension_numbers<[1], [0], [0], [1], [0, 0, 1, 1], [], []>} : vector<256x36xbf16>, vector<36x128xbf16>, vector<256x128xf32> -> vector<256x128xf32>
    %c0_3 = arith.constant 0 : index
    %c0_4 = arith.constant 0 : index
    %3 = vector.load %arg3[%c0_3, %c0_4] : memref<8x128xf32, #tpu.memory_space<vmem>>, vector<1x128xf32>
    %c1 = arith.constant 1 : index
    %c0_5 = arith.constant 0 : index
    %4 = vector.load %arg3[%c1, %c0_5] : memref<8x128xf32, #tpu.memory_space<vmem>>, vector<1x128xf32>
    %5 = vector.broadcast %3 : vector<1x128xf32> to vector<256x128xf32>
    %6 = arith.mulf %2, %5 : vector<256x128xf32>
    %7 = vector.broadcast %4 : vector<1x128xf32> to vector<256x128xf32>
    %8 = arith.addf %6, %7 : vector<256x128xf32>
    %cst_6 = arith.constant 0.000000e+00 : f32
    %9 = vector.broadcast %cst_6 : f32 to vector<256x128xf32>
    %10 = arith.cmpf oge, %8, %9 : vector<256x128xf32>
    %cst_7 = arith.constant 2.000000e-01 : f32
    %11 = vector.broadcast %cst_7 : f32 to vector<256x128xf32>
    %12 = arith.mulf %11, %8 : vector<256x128xf32>
    %13 = arith.select %10, %8, %12 : vector<256x128xi1>, vector<256x128xf32>
    %c0_8 = arith.constant 0 : index
    %c0_9 = arith.constant 0 : index
    %14 = vector.load %arg4[%c0_8, %c0_9] : memref<256x128xf32, #tpu.memory_space<vmem>>, vector<256x128xf32>
    tpu.vector_store %arg4[%c0_8, %c0_9], %13 {strides = array<i32>} : memref<256x128xf32, #tpu.memory_space<vmem>>, vector<256x128xf32>,
    return
  }
  func.func @transform_0(%arg0: i32) -> (i32, i32) {
    %c0_i32 = arith.constant 0 : i32
    %c0_i32_0 = arith.constant 0 : i32
    return %arg0, %c0_i32 : i32, i32
  }
  func.func @transform_1(%arg0: i32) -> (i32, i32) {
    %c0_i32 = arith.constant 0 : i32
    %c0_i32_0 = arith.constant 0 : i32
    %c0_i32_1 = arith.constant 0 : i32
    return %c0_i32, %c0_i32_0 : i32, i32
  }
  func.func @transform_2(%arg0: i32) -> (i32, i32) {
    %c0_i32 = arith.constant 0 : i32
    %c0_i32_0 = arith.constant 0 : i32
    %c0_i32_1 = arith.constant 0 : i32
    return %c0_i32, %c0_i32_0 : i32, i32
  }
  func.func @transform_3(%arg0: i32) -> (i32, i32) {
    %c0_i32 = arith.constant 0 : i32
    %c0_i32_0 = arith.constant 0 : i32
    return %arg0, %c0_i32 : i32, i32
  }
}

</mosaic_0001>

<bundles_post_ra>
// kernel: basic_conv_forward.3
= control target key start
LH: loop header
LB: loop body
LE: loop exit
PB: predicated region body
PF: predicated region fallthrough
CT: control target
= control target key end

     0   :  { %vm147_vm0 = vcmask 293888   ;;  %vm196_vm1 = vcmask 1041408   ;;  %s951_s1 = inlined_call_operand.vmem [shape: bf16[36,128], index: 1, kind: input, shape index: {}]   ;;  %s952_s0 = inlined_call_operand.vmem [shape: bf16[256,36], index: 0, kind: input, shape index: {}]   ;;  %s953_s2 = inlined_call_operand.vmem [shape: f32[8,128], index: 2, kind: input, shape index: {}]   ;;  %s954_s3 = inlined_call_operand.vmem [shape: f32[256,128], index: 3, kind: output, shape index: {}]  }
   0x1   :  { %v669_v0 = vld [vmem:[%s951_s1] sm:$0xff]   ;;  %v670_v1 = vld [vmem:[%s951_s1 + $0x8] sm:$0xff]   ;;  %v671_v2 = vld [vmem:[%s951_s1 + $0x10] ss:$0 sps:$4 sm:$0x33]  }
   0x2   :  { %623 = vmatprep.subr.bf16.mxu0 %v669_v0  ;;  %661 = vmatprep.subr.bf16.mxu1 %v669_v0  ;;  %v672_v3 = vld [vmem:[%s952_s0] sm:$0xff]   ;;  %v198_v5 = vsel %vm196_vm1, %v671_v2, 0  ;;  %v674_v6 = vld [vmem:[%s952_s0 + $0x8] sm:$0xff]   ;;  %v676_v8 = vld [vmem:[%s952_s0 + $0x10] sm:$0xff]  }
   0x3   :  { %624 = vmatpush3.bf16.msra.mxu0 %v669_v0  ;;  %664 = vmatpush3.bf16.msra.mxu1 %v669_v0  ;;  %v673_v4 = vld [vmem:[%s952_s0 + $0x40] sm:$0xff]   ;;  %v675_v7 = vld [vmem:[%s952_s0 + $0x48] sm:$0xff]   ;;  %v677_v9 = vld [vmem:[%s952_s0 + $0x50] sm:$0xff]  }
   0x4   :  { %625 = vmatprep.subr.bf16.mxu0 %v670_v1  ;;  %662 = vmatprep.subr.bf16.mxu1 %v670_v1  ;;  %v678_v10 = vld [vmem:[%s952_s0 + $0x18] sm:$0xff]   ;;  %v680_v12 = vld [vmem:[%s952_s0 + $0x20] sm:$0xff]   ;;  %v682_v14 = vld [vmem:[%s952_s0 + $0x28] sm:$0xff]  }
   0x5   :  { %629 = vmatprep.mubr.msk.bf16.mxu0 %vm147_vm0, %v672_v3  ;;  %645 = vmatprep.mubr.msk.bf16.mxu1 %vm147_vm0, %v673_v4  ;;  %v679_v11 = vld [vmem:[%s952_s0 + $0x58] sm:$0xff]   ;;  %v681_v13 = vld [vmem:[%s952_s0 + $0x60] sm:$0xff]   ;;  %v683_v15 = vld [vmem:[%s952_s0 + $0x68] sm:$0xff]  }
   0x6   :  { %v684_v16 = vld [vmem:[%s952_s0 + $0x30] sm:$0xff]   ;;  %v686_v18 = vld [vmem:[%s952_s0 + $0x38] sm:$0xff]   ;;  %v784_v20 = vld [vmem:[%s953_s2] ss:$0 sm:$0xff] }
   0x7   :  { %626 = vmatpush3.bf16.msra.mxu0 %v670_v1  ;;  %665 = vmatpush3.bf16.msra.mxu1 %v670_v1  ;;  %v685_v17 = vld [vmem:[%s952_s0 + $0x70] sm:$0xff]   ;;  %v687_v19 = vld [vmem:[%s952_s0 + $0x78] sm:$0xff]   ;;  %v789_v22 = vld [vmem:[%s953_s2 + $0x1] ss:$0 sm:$0xff] }
   0x8   :  { %667 = vmatprep.subr.msk.bf16.mxu0 %vm196_vm1, %v671_v2  ;;  %668 = vmatprep.subr.msk.bf16.mxu1 %vm196_vm1, %v671_v2 }
   0xb   :  { %628 = vmatpush3.bf16.msra.mxu0 %v198_v5  ;;  %666 = vmatpush3.bf16.msra.mxu1 %v198_v5 }
   0xe   :  { %630 = vmatmul.mubr.msk.bf16.vlgmr.msra.gmra.mrb[0].mxu0 %vm147_vm0, %v674_v6  ;;  %646 = vmatmul.mubr.msk.bf16.vlgmr.msra.gmra.mrb[0].mxu1 %vm147_vm0, %v675_v7 }
   0xf   :  { %633 = vmatprep.mubr.msk.bf16.mxu0 %vm147_vm0, %v676_v8  ;;  %649 = vmatprep.mubr.msk.bf16.mxu1 %vm147_vm0, %v677_v9 }
  0x16   :  { %634 = vmatmul.mubr.msk.bf16.gmra.mrb[4].mxu0 %vm147_vm0, %v678_v10  ;;  %650 = vmatmul.mubr.msk.bf16.gmra.mrb[4].mxu1 %vm147_vm0, %v679_v11 }
  0x17   :  { %637 = vmatprep.mubr.msk.bf16.mxu0 %vm147_vm0, %v680_v12  ;;  %653 = vmatprep.mubr.msk.bf16.mxu1 %vm147_vm0, %v681_v13 }
  0x1e   :  { %638 = vmatmul.mubr.msk.bf16.gmra.mrb[8].mxu0 %vm147_vm0, %v682_v14  ;;  %654 = vmatmul.mubr.msk.bf16.gmra.mrb[8].mxu1 %vm147_vm0, %v683_v15 }
  0x1f   :  { %641 = vmatprep.mubr.msk.bf16.mxu0 %vm147_vm0, %v684_v16  ;;  %657 = vmatprep.mubr.msk.bf16.mxu1 %vm147_vm0, %v685_v17 }
  0x26   :  { %642 = vmatmul.mubr.msk.bf16.gmra.mrb[12].mxu0 %vm147_vm0, %v686_v18  ;;  %658 = vmatmul.mubr.msk.bf16.gmra.mrb[12].mxu1 %vm147_vm0, %v687_v19 }
  0xe1   :  { %v631_v21 = vpop.f32.mrb[0].mxu0  ;;  %v647_v23 = vpop.f32.mrb[0].mxu1 }
  0xe2   :  { %v369_v24 = vmul.f32 %v631_v21, %v784_v20  ;;  %v385_v25 = vmul.f32 %v647_v23, %v784_v20  ;;  %v234_v26 = vpop.f32.mrb[1].mxu0  ;;  %v298_v27 = vpop.f32.mrb[1].mxu1 }
  0xe3   :  { %v367_v28 = vmul.f32 %v784_v20, %v234_v26  ;;  %v383_v29 = vmul.f32 %v784_v20, %v298_v27  ;;  %v632_v30 = vpop.f32.mrb[2].mxu0  ;;  %v648_v31 = vpop.f32.mrb[2].mxu1 }
  0xe4   :  { %v405_v32 = vadd.f32 %v789_v22, %v369_v24  ;;  %v421_v33 = vadd.f32 %v789_v22, %v385_v25  ;;  %v370_v34 = vmul.f32 %v632_v30, %v784_v20  ;;  %v386_v35 = vmul.f32 %v648_v31, %v784_v20  ;;  %v237_v36 = vpop.f32.mrb[3].mxu0  ;;  %v301_v37 = vpop.f32.mrb[3].mxu1 }
  0xe5   :  { %v403_v38 = vadd.f32 %v789_v22, %v367_v28  ;;  %v419_v39 = vadd.f32 %v789_v22, %v383_v29  ;;  %v368_v40 = vmul.f32 %v784_v20, %v237_v36  ;;  %v384_v41 = vmul.f32 %v784_v20, %v301_v37 }
  0xe6   :  { %vm437_vm2 = vcmp.ge.f32.partialorder %v405_v32, 0.0  ;;  %v469_v42 = vmul.f32 0.2, %v405_v32  ;;  %vm453_vm3 = vcmp.ge.f32.partialorder %v421_v33, 0.0  ;;  %v485_v43 = vmul.f32 0.2, %v421_v33 }
  0xe7   :  { %vm435_vm4 = vcmp.ge.f32.partialorder %v403_v38, 0.0  ;;  %v467_v44 = vmul.f32 0.2, %v403_v38  ;;  %vm451_vm5 = vcmp.ge.f32.partialorder %v419_v39, 0.0  ;;  %v483_v45 = vmul.f32 0.2, %v419_v39 }
  0xe8   :  { %v501_v46 = vsel %vm437_vm2, %v405_v32, %v469_v42  ;;  %v517_v47 = vsel %vm453_vm3, %v421_v33, %v485_v43  ;;  %v406_v48 = vadd.f32 %v789_v22, %v370_v34  ;;  %v422_v49 = vadd.f32 %v789_v22, %v386_v35 }
  0xe9   :  { %533 = vst [vmem:[%s954_s3 + $0x10] sm:$0xff] %v501_v46  ;;  %549 = vst [vmem:[%s954_s3 + $0x90] sm:$0xff] %v517_v47  ;;  %v499_v50 = vsel %vm435_vm4, %v403_v38, %v467_v44  ;;  %v515_v51 = vsel %vm451_vm5, %v419_v39, %v483_v45  ;;  %v404_v52 = vadd.f32 %v789_v22, %v368_v40  ;;  %v635_v54 = vpop.f32.mrb[4].mxu0  ;;  %v651_v55 = vpop.f32.mrb[4].mxu1 }
  0xea   :  { %v420_v53 = vadd.f32 %v789_v22, %v384_v41  ;;  %531 = vst [vmem:[%s954_s3] sm:$0xff] %v499_v50  ;;  %547 = vst [vmem:[%s954_s3 + $0x80] sm:$0xff] %v515_v51  ;;  %vm438_vm6 = vcmp.ge.f32.partialorder %v406_v48, 0.0  ;;  %v470_v56 = vmul.f32 0.2, %v406_v48  ;;  %vm454_vm7 = vcmp.ge.f32.partialorder %v422_v49, 0.0  ;;  %v250_v0 = vpop.f32.mrb[5].mxu0 }
  0xeb   :  { %v486_v57 = vmul.f32 0.2, %v422_v49  ;;  %vm436_vm8 = vcmp.ge.f32.partialorder %v404_v52, 0.0  ;;  %v468_v58 = vmul.f32 0.2, %v404_v52  ;;  %v373_v62 = vmul.f32 %v635_v54, %v784_v20  ;;  %v314_v1 = vpop.f32.mrb[5].mxu1 }
  0xec   :  { %vm452_vm9 = vcmp.ge.f32.partialorder %v420_v53, 0.0  ;;  %v484_v59 = vmul.f32 0.2, %v420_v53  ;;  %v502_v60 = vsel %vm438_vm6, %v406_v48, %v470_v56  ;;  %v389_v63 = vmul.f32 %v651_v55, %v784_v20  ;;  %v636_v6 = vpop.f32.mrb[6].mxu0  ;;  %v652_v7 = vpop.f32.mrb[6].mxu1 }
  0xed   :  { %v518_v61 = vsel %vm454_vm7, %v422_v49, %v486_v57  ;;  %534 = vst [vmem:[%s954_s3 + $0x18] sm:$0xff] %v502_v60  ;;  %v500_v2 = vsel %vm436_vm8, %v404_v52, %v468_v58  ;;  %v371_v4 = vmul.f32 %v784_v20, %v250_v0  ;;  %v387_v5 = vmul.f32 %v784_v20, %v314_v1  ;;  %v253_v12 = vpop.f32.mrb[7].mxu0  ;;  %v317_v13 = vpop.f32.mrb[7].mxu1 }
  0xee   :  { %550 = vst [vmem:[%s954_s3 + $0x98] sm:$0xff] %v518_v61  ;;  %v516_v3 = vsel %vm452_vm9, %v420_v53, %v484_v59  ;;  %532 = vst [vmem:[%s954_s3 + $0x8] sm:$0xff] %v500_v2  ;;  %v409_v8 = vadd.f32 %v789_v22, %v373_v62  ;;  %v425_v9 = vadd.f32 %v789_v22, %v389_v63 }
  0xef   :  { %548 = vst [vmem:[%s954_s3 + $0x88] sm:$0xff] %v516_v3  ;;  %v374_v10 = vmul.f32 %v636_v6, %v784_v20  ;;  %v390_v11 = vmul.f32 %v652_v7, %v784_v20  ;;  %v407_v14 = vadd.f32 %v789_v22, %v371_v4  ;;  %v423_v15 = vadd.f32 %v789_v22, %v387_v5 }
  0xf0   :  { %v372_v16 = vmul.f32 %v784_v20, %v253_v12  ;;  %v388_v17 = vmul.f32 %v784_v20, %v317_v13  ;;  %vm441_vm10 = vcmp.ge.f32.partialorder %v409_v8, 0.0  ;;  %v473_v18 = vmul.f32 0.2, %v409_v8 }
  0xf1   :  { %vm457_vm11 = vcmp.ge.f32.partialorder %v425_v9, 0.0  ;;  %v489_v19 = vmul.f32 0.2, %v425_v9  ;;  %vm439_vm12 = vcmp.ge.f32.partialorder %v407_v14, 0.0  ;;  %v471_v21 = vmul.f32 0.2, %v407_v14 }
  0xf2   :  { %vm455_vm13 = vcmp.ge.f32.partialorder %v423_v15, 0.0  ;;  %v487_v23 = vmul.f32 0.2, %v423_v15  ;;  %v505_v24 = vsel %vm441_vm10, %v409_v8, %v473_v18  ;;  %v410_v26 = vadd.f32 %v789_v22, %v374_v10  ;;  %v639_v28 = vpop.f32.mrb[8].mxu0  ;;  %v655_v29 = vpop.f32.mrb[8].mxu1 }
  0xf3   :  { %v521_v25 = vsel %vm457_vm11, %v425_v9, %v489_v19  ;;  %v426_v27 = vadd.f32 %v789_v22, %v390_v11  ;;  %537 = vst [vmem:[%s954_s3 + $0x30] sm:$0xff] %v505_v24  ;;  %v503_v30 = vsel %vm439_vm12, %v407_v14, %v471_v21  ;;  %v408_v32 = vadd.f32 %v789_v22, %v372_v16  ;;  %v266_v34 = vpop.f32.mrb[9].mxu0  ;;  %v330_v35 = vpop.f32.mrb[9].mxu1 }
  0xf4   :  { %553 = vst [vmem:[%s954_s3 + $0xb0] sm:$0xff] %v521_v25  ;;  %v519_v31 = vsel %vm455_vm13, %v423_v15, %v487_v23  ;;  %v424_v33 = vadd.f32 %v789_v22, %v388_v17  ;;  %535 = vst [vmem:[%s954_s3 + $0x20] sm:$0xff] %v503_v30  ;;  %vm442_vm14 = vcmp.ge.f32.partialorder %v410_v26, 0.0  ;;  %v474_v36 = vmul.f32 0.2, %v410_v26  ;;  %v640_v44 = vpop.f32.mrb[10].mxu0 }
  0xf5   :  { %551 = vst [vmem:[%s954_s3 + $0xa0] sm:$0xff] %v519_v31  ;;  %vm458_vm15 = vcmp.ge.f32.partialorder %v426_v27, 0.0  ;;  %v490_v37 = vmul.f32 0.2, %v426_v27  ;;  %vm440_vm0 = vcmp.ge.f32.partialorder %v408_v32, 0.0  ;;  %v377_v42 = vmul.f32 %v639_v28, %v784_v20  ;;  %v656_v45 = vpop.f32.mrb[10].mxu1 }
  0xf6   :  { %v472_v38 = vmul.f32 0.2, %v408_v32  ;;  %vm456_vm1 = vcmp.ge.f32.partialorder %v424_v33, 0.0  ;;  %v488_v39 = vmul.f32 0.2, %v424_v33  ;;  %v506_v40 = vsel %vm442_vm14, %v410_v26, %v474_v36  ;;  %v269_v50 = vpop.f32.mrb[11].mxu0 }
  0xf7   :  { %v522_v41 = vsel %vm458_vm15, %v426_v27, %v490_v37  ;;  %v393_v43 = vmul.f32 %v655_v29, %v784_v20  ;;  %538 = vst [vmem:[%s954_s3 + $0x38] sm:$0xff] %v506_v40  ;;  %v375_v48 = vmul.f32 %v784_v20, %v266_v34  ;;  %v391_v49 = vmul.f32 %v784_v20, %v330_v35  ;;  %v333_v51 = vpop.f32.mrb[11].mxu1 }
  0xf8   :  { %554 = vst [vmem:[%s954_s3 + $0xb8] sm:$0xff] %v522_v41  ;;  %v504_v46 = vsel %vm440_vm0, %v408_v32, %v472_v38  ;;  %v520_v47 = vsel %vm456_vm1, %v424_v33, %v488_v39  ;;  %v413_v52 = vadd.f32 %v789_v22, %v377_v42  ;;  %v378_v54 = vmul.f32 %v640_v44, %v784_v20 }
  0xf9   :  { %536 = vst [vmem:[%s954_s3 + $0x28] sm:$0xff] %v504_v46  ;;  %552 = vst [vmem:[%s954_s3 + $0xa8] sm:$0xff] %v520_v47  ;;  %v429_v53 = vadd.f32 %v789_v22, %v393_v43  ;;  %v394_v55 = vmul.f32 %v656_v45, %v784_v20  ;;  %v411_v56 = vadd.f32 %v789_v22, %v375_v48  ;;  %v643_v60 = vpop.f32.mrb[12].mxu0  ;;  %v659_v61 = vpop.f32.mrb[12].mxu1 }
  0xfa   :  { %v427_v57 = vadd.f32 %v789_v22, %v391_v49  ;;  %v376_v58 = vmul.f32 %v784_v20, %v269_v50  ;;  %v392_v59 = vmul.f32 %v784_v20, %v333_v51  ;;  %vm445_vm2 = vcmp.ge.f32.partialorder %v413_v52, 0.0  ;;  %v282_v6 = vpop.f32.mrb[13].mxu0  ;;  %v346_v7 = vpop.f32.mrb[13].mxu1 }
  0xfb   :  { %v477_v62 = vmul.f32 0.2, %v413_v52  ;;  %vm461_vm3 = vcmp.ge.f32.partialorder %v429_v53, 0.0  ;;  %v493_v63 = vmul.f32 0.2, %v429_v53  ;;  %vm443_vm4 = vcmp.ge.f32.partialorder %v411_v56, 0.0 }
  0xfc   :  { %v475_v0 = vmul.f32 0.2, %v411_v56  ;;  %vm459_vm5 = vcmp.ge.f32.partialorder %v427_v57, 0.0  ;;  %v491_v1 = vmul.f32 0.2, %v427_v57  ;;  %v414_v4 = vadd.f32 %v789_v22, %v378_v54  ;;  %v644_v12 = vpop.f32.mrb[14].mxu0 }
  0xfd   :  { %v509_v2 = vsel %vm445_vm2, %v413_v52, %v477_v62  ;;  %v525_v3 = vsel %vm461_vm3, %v429_v53, %v493_v63  ;;  %v430_v5 = vadd.f32 %v789_v22, %v394_v55  ;;  %v412_v10 = vadd.f32 %v789_v22, %v376_v58  ;;  %v660_v13 = vpop.f32.mrb[14].mxu1  ;;  %v285_v24 = vpop.f32.mrb[15].mxu0 }
  0xfe   :  { %541 = vst [vmem:[%s954_s3 + $0x50] sm:$0xff] %v509_v2  ;;  %557 = vst [vmem:[%s954_s3 + $0xd0] sm:$0xff] %v525_v3  ;;  %v507_v8 = vsel %vm443_vm4, %v411_v56, %v475_v0  ;;  %v523_v9 = vsel %vm459_vm5, %v427_v57, %v491_v1  ;;  %v428_v11 = vadd.f32 %v789_v22, %v392_v59  ;;  %vm446_vm6 = vcmp.ge.f32.partialorder %v414_v4, 0.0  ;;  %v349_v25 = vpop.f32.mrb[15].mxu1 }
  0xff   :  { %539 = vst [vmem:[%s954_s3 + $0x40] sm:$0xff] %v507_v8  ;;  %555 = vst [vmem:[%s954_s3 + $0xc0] sm:$0xff] %v523_v9  ;;  %v478_v14 = vmul.f32 0.2, %v414_v4  ;;  %vm462_vm7 = vcmp.ge.f32.partialorder %v430_v5, 0.0  ;;  %vm444_vm8 = vcmp.ge.f32.partialorder %v412_v10, 0.0  ;;  %v381_v21 = vmul.f32 %v643_v60, %v784_v20 }
 0x100   :  { %v494_v15 = vmul.f32 0.2, %v430_v5  ;;  %v476_v16 = vmul.f32 0.2, %v412_v10  ;;  %vm460_vm9 = vcmp.ge.f32.partialorder %v428_v11, 0.0  ;;  %v397_v23 = vmul.f32 %v659_v61, %v784_v20 }
 0x101   :  { %v492_v17 = vmul.f32 0.2, %v428_v11  ;;  %v510_v18 = vsel %vm446_vm6, %v414_v4, %v478_v14  ;;  %v379_v28 = vmul.f32 %v784_v20, %v282_v6  ;;  %v395_v29 = vmul.f32 %v784_v20, %v346_v7 }
 0x102   :  { %v526_v19 = vsel %vm462_vm7, %v430_v5, %v494_v15  ;;  %542 = vst [vmem:[%s954_s3 + $0x58] sm:$0xff] %v510_v18  ;;  %v508_v26 = vsel %vm444_vm8, %v412_v10, %v476_v16  ;;  %v417_v30 = vadd.f32 %v789_v22, %v381_v21  ;;  %v433_v31 = vadd.f32 %v789_v22, %v397_v23 }
 0x103   :  { %558 = vst [vmem:[%s954_s3 + $0xd8] sm:$0xff] %v526_v19  ;;  %v524_v27 = vsel %vm460_vm9, %v428_v11, %v492_v17  ;;  %540 = vst [vmem:[%s954_s3 + $0x48] sm:$0xff] %v508_v26  ;;  %v382_v32 = vmul.f32 %v644_v12, %v784_v20  ;;  %v398_v33 = vmul.f32 %v660_v13, %v784_v20 }
 0x104   :  { %556 = vst [vmem:[%s954_s3 + $0xc8] sm:$0xff] %v524_v27  ;;  %v415_v34 = vadd.f32 %v789_v22, %v379_v28  ;;  %v431_v35 = vadd.f32 %v789_v22, %v395_v29  ;;  %v380_v36 = vmul.f32 %v784_v20, %v285_v24  ;;  %v396_v37 = vmul.f32 %v784_v20, %v349_v25 }
 0x105   :  { %vm449_vm10 = vcmp.ge.f32.partialorder %v417_v30, 0.0  ;;  %v481_v38 = vmul.f32 0.2, %v417_v30  ;;  %vm465_vm11 = vcmp.ge.f32.partialorder %v433_v31, 0.0  ;;  %v497_v39 = vmul.f32 0.2, %v433_v31 }
 0x106   :  { %vm447_vm12 = vcmp.ge.f32.partialorder %v415_v34, 0.0  ;;  %v479_v40 = vmul.f32 0.2, %v415_v34  ;;  %vm463_vm13 = vcmp.ge.f32.partialorder %v431_v35, 0.0  ;;  %v495_v41 = vmul.f32 0.2, %v431_v35 }
 0x107   :  { %v513_v42 = vsel %vm449_vm10, %v417_v30, %v481_v38  ;;  %v529_v43 = vsel %vm465_vm11, %v433_v31, %v497_v39  ;;  %v418_v44 = vadd.f32 %v789_v22, %v382_v32  ;;  %v434_v45 = vadd.f32 %v789_v22, %v398_v33 }
 0x108   :  { %545 = vst [vmem:[%s954_s3 + $0x70] sm:$0xff] %v513_v42  ;;  %561 = vst [vmem:[%s954_s3 + $0xf0] sm:$0xff] %v529_v43  ;;  %v511_v20 = vsel %vm447_vm12, %v415_v34, %v479_v40  ;;  %v527_v46 = vsel %vm463_vm13, %v431_v35, %v495_v41  ;;  %v416_v47 = vadd.f32 %v789_v22, %v380_v36 }
 0x109   :  { %v432_v48 = vadd.f32 %v789_v22, %v396_v37  ;;  %543 = vst [vmem:[%s954_s3 + $0x60] sm:$0xff] %v511_v20  ;;  %559 = vst [vmem:[%s954_s3 + $0xe0] sm:$0xff] %v527_v46  ;;  %vm450_vm14 = vcmp.ge.f32.partialorder %v418_v44, 0.0  ;;  %v482_v49 = vmul.f32 0.2, %v418_v44  ;;  %vm466_vm15 = vcmp.ge.f32.partialorder %v434_v45, 0.0 }
 0x10a   :  { %v498_v50 = vmul.f32 0.2, %v434_v45  ;;  %vm448_vm0 = vcmp.ge.f32.partialorder %v416_v47, 0.0  ;;  %v480_v51 = vmul.f32 0.2, %v416_v47 }
 0x10b   :  { %vm464_vm1 = vcmp.ge.f32.partialorder %v432_v48, 0.0  ;;  %v496_v52 = vmul.f32 0.2, %v432_v48  ;;  %v514_v53 = vsel %vm450_vm14, %v418_v44, %v482_v49 }
 0x10c   :  { %v530_v54 = vsel %vm466_vm15, %v434_v45, %v498_v50  ;;  %546 = vst [vmem:[%s954_s3 + $0x78] sm:$0xff] %v514_v53  ;;  %v512_v22 = vsel %vm448_vm0, %v416_v47, %v480_v51 }
 0x10d   :  { %562 = vst [vmem:[%s954_s3 + $0xf8] sm:$0xff] %v530_v54  ;;  %v528_v55 = vsel %vm464_vm1, %v432_v48, %v496_v52  ;;  %544 = vst [vmem:[%s954_s3 + $0x68] sm:$0xff] %v512_v22 }
 0x10e   :  { %560 = vst [vmem:[%s954_s3 + $0xe8] sm:$0xff] %v528_v55 }

// kernel: basic_conv_forward.2
= control target key start
LH: loop header
LB: loop body
LE: loop exit
PB: predicated region body
PF: predicated region fallthrough
CT: control target
= control target key end

     0   :  { %vm144_vm0 = vcmask 293888   ;;  %vm193_vm1 = vcmask 1041408   ;;  %vm464_vm2 = vcmask 1040384   ;;  %s736_s1 = inlined_call_operand.vmem [shape: bf16[36,128], index: 1, kind: input, shape index: {}]   ;;  %s737_s0 = inlined_call_operand.vmem [shape: bf16[256,36], index: 0, kind: input, shape index: {}]   ;;  %s738_s2 = inlined_call_operand.vmem [shape: f32[8,128], index: 2, kind: output, shape index: {}]  }
   0x1   :  { %v572_v0 = vld [vmem:[%s736_s1] sm:$0xff]   ;;  %v573_v1 = vld [vmem:[%s736_s1 + $0x8] sm:$0xff]   ;;  %v574_v2 = vld [vmem:[%s736_s1 + $0x10] ss:$0 sps:$4 sm:$0x33]  }
   0x2   :  { %526 = vmatprep.subr.bf16.mxu0 %v572_v0  ;;  %v575_v3 = vld [vmem:[%s737_s0] sm:$0xff]   ;;  %564 = vmatprep.subr.bf16.mxu1 %v572_v0  ;;  %v195_v4 = vsel %vm193_vm1, %v574_v2, 0  ;;  %v576_v5 = vld [vmem:[%s737_s0 + $0x8] sm:$0xff]   ;;  %v577_v6 = vld [vmem:[%s737_s0 + $0x10] sm:$0xff]  }
   0x3   :  { %527 = vmatpush3.bf16.msra.mxu0 %v572_v0  ;;  %567 = vmatpush3.bf16.msra.mxu1 %v572_v0  ;;  %v583_v7 = vld [vmem:[%s737_s0 + $0x40] sm:$0xff]   ;;  %v584_v8 = vld [vmem:[%s737_s0 + $0x48] sm:$0xff]   ;;  %v585_v9 = vld [vmem:[%s737_s0 + $0x50] sm:$0xff]  }
   0x4   :  { %528 = vmatprep.subr.bf16.mxu0 %v573_v1  ;;  %532 = vmatprep.mubr.msk.bf16.mxu0 %vm144_vm0, %v575_v3  ;;  %v578_v10 = vld [vmem:[%s737_s0 + $0x18] sm:$0xff]   ;;  %v579_v12 = vld [vmem:[%s737_s0 + $0x20] sm:$0xff]   ;;  %v580_v14 = vld [vmem:[%s737_s0 + $0x28] sm:$0xff]  }
   0x5   :  { %565 = vmatprep.subr.bf16.mxu1 %v573_v1  ;;  %548 = vmatprep.mubr.msk.bf16.mxu1 %vm144_vm0, %v583_v7  ;;  %v586_v11 = vld [vmem:[%s737_s0 + $0x58] sm:$0xff]   ;;  %v587_v13 = vld [vmem:[%s737_s0 + $0x60] sm:$0xff]   ;;  %v588_v15 = vld [vmem:[%s737_s0 + $0x68] sm:$0xff]  }
   0x6   :  { %v581_v16 = vld [vmem:[%s737_s0 + $0x30] sm:$0xff]   ;;  %v582_v18 = vld [vmem:[%s737_s0 + $0x38] sm:$0xff]  }
   0x7   :  { %529 = vmatpush3.bf16.msra.mxu0 %v573_v1  ;;  %568 = vmatpush3.bf16.msra.mxu1 %v573_v1  ;;  %v589_v17 = vld [vmem:[%s737_s0 + $0x70] sm:$0xff]   ;;  %v590_v19 = vld [vmem:[%s737_s0 + $0x78] sm:$0xff]  }
   0x8   :  { %570 = vmatprep.subr.msk.bf16.mxu0 %vm193_vm1, %v574_v2  ;;  %571 = vmatprep.subr.msk.bf16.mxu1 %vm193_vm1, %v574_v2 }
   0xb   :  { %531 = vmatpush3.bf16.msra.mxu0 %v195_v4  ;;  %569 = vmatpush3.bf16.msra.mxu1 %v195_v4 }
   0xe   :  { %533 = vmatmul.mubr.msk.bf16.vlgmr.msra.gmra.mrb[0].mxu0 %vm144_vm0, %v576_v5  ;;  %549 = vmatmul.mubr.msk.bf16.vlgmr.msra.gmra.mrb[0].mxu1 %vm144_vm0, %v584_v8 }
   0xf   :  { %536 = vmatprep.mubr.msk.bf16.mxu0 %vm144_vm0, %v577_v6  ;;  %552 = vmatprep.mubr.msk.bf16.mxu1 %vm144_vm0, %v585_v9 }
  0x16   :  { %537 = vmatmul.mubr.msk.bf16.gmra.mrb[4].mxu0 %vm144_vm0, %v578_v10  ;;  %553 = vmatmul.mubr.msk.bf16.gmra.mrb[4].mxu1 %vm144_vm0, %v586_v11 }
  0x17   :  { %540 = vmatprep.mubr.msk.bf16.mxu0 %vm144_vm0, %v579_v12  ;;  %556 = vmatprep.mubr.msk.bf16.mxu1 %vm144_vm0, %v587_v13 }
  0x1e   :  { %541 = vmatmul.mubr.msk.bf16.gmra.mrb[8].mxu0 %vm144_vm0, %v580_v14  ;;  %557 = vmatmul.mubr.msk.bf16.gmra.mrb[8].mxu1 %vm144_vm0, %v588_v15 }
  0x1f   :  { %544 = vmatprep.mubr.msk.bf16.mxu0 %vm144_vm0, %v581_v16  ;;  %560 = vmatprep.mubr.msk.bf16.mxu1 %vm144_vm0, %v589_v17 }
  0x26   :  { %545 = vmatmul.mubr.msk.bf16.gmra.mrb[12].mxu0 %vm144_vm0, %v582_v18  ;;  %561 = vmatmul.mubr.msk.bf16.gmra.mrb[12].mxu1 %vm144_vm0, %v590_v19 }
  0xe1   :  { %v534_v20 = vpop.f32.mrb[0].mxu0  ;;  %v682_v21 = vpop.f32.mrb[0].mxu1 }
  0xe2   :  { %v231_v22 = vpop.f32.mrb[1].mxu0  ;;  %v684_v23 = vpop.f32.mrb[1].mxu1  ;;  %v397_v31 = vmul.f32 %v534_v20, %v534_v20 }
  0xe3   :  { %v535_v24 = vpop.f32.mrb[2].mxu0  ;;  %v686_v25 = vpop.f32.mrb[2].mxu1  ;;  %v395_v28 = vmul.f32 %v231_v22, %v231_v22 }
  0xe4   :  { %v234_v26 = vpop.f32.mrb[3].mxu0  ;;  %v688_v27 = vpop.f32.mrb[3].mxu1  ;;  %v398_v34 = vmul.f32 %v535_v24, %v535_v24 }
  0xe5   :  { %v358_v29 = vadd.f32 %v234_v26, %v231_v22  ;;  %v396_v30 = vmul.f32 %v234_v26, %v234_v26 }
  0xe7   :  { %v359_v32 = vadd.f32 %v534_v20, %v358_v29  ;;  %v427_v33 = vadd.f32 %v396_v30, %v395_v28 }
  0xe9   :  { %v428_v35 = vadd.f32 %v427_v33, %v397_v31  ;;  %v538_v36 = vpop.f32.mrb[4].mxu0  ;;  %v360_v37 = vadd.f32 %v535_v24, %v359_v32  ;;  %v690_v38 = vpop.f32.mrb[4].mxu1 }
  0xea   :  { %v247_v39 = vpop.f32.mrb[5].mxu0  ;;  %v692_v40 = vpop.f32.mrb[5].mxu1  ;;  %v401_v51 = vmul.f32 %v538_v36, %v538_v36 }
  0xeb   :  { %v361_v41 = vadd.f32 %v360_v37, %v247_v39  ;;  %v399_v42 = vmul.f32 %v247_v39, %v247_v39  ;;  %v429_v43 = vadd.f32 %v428_v35, %v398_v34  ;;  %v539_v44 = vpop.f32.mrb[6].mxu0  ;;  %v694_v45 = vpop.f32.mrb[6].mxu1  ;;  %v411_v37 = vmul.f32 %v684_v23, %v684_v23 }
  0xec   :  { %v250_v46 = vpop.f32.mrb[7].mxu0  ;;  %v696_v47 = vpop.f32.mrb[7].mxu1  ;;  %v402_v54 = vmul.f32 %v539_v44, %v539_v44 }
  0xed   :  { %v430_v48 = vadd.f32 %v429_v43, %v399_v42  ;;  %v362_v49 = vadd.f32 %v361_v41, %v250_v46  ;;  %v400_v50 = vmul.f32 %v250_v46, %v250_v46  ;;  %v413_v46 = vmul.f32 %v682_v21, %v682_v21 }
  0xef   :  { %v363_v52 = vadd.f32 %v538_v36, %v362_v49  ;;  %v431_v53 = vadd.f32 %v430_v48, %v400_v50  ;;  %v414_v50 = vmul.f32 %v686_v25, %v686_v25 }
  0xf1   :  { %v432_v55 = vadd.f32 %v431_v53, %v401_v51  ;;  %v542_v56 = vpop.f32.mrb[8].mxu0  ;;  %v364_v57 = vadd.f32 %v539_v44, %v363_v52  ;;  %v698_v58 = vpop.f32.mrb[8].mxu1  ;;  %v412_v44 = vmul.f32 %v688_v27, %v688_v27 }
  0xf2   :  { %v263_v59 = vpop.f32.mrb[9].mxu0  ;;  %v327_v60 = vpop.f32.mrb[9].mxu1  ;;  %v405_v7 = vmul.f32 %v542_v56, %v542_v56 }
  0xf3   :  { %v365_v61 = vadd.f32 %v364_v57, %v263_v59  ;;  %v403_v62 = vmul.f32 %v263_v59, %v263_v59  ;;  %v433_v63 = vadd.f32 %v432_v55, %v402_v54  ;;  %v543_v0 = vpop.f32.mrb[10].mxu0  ;;  %v700_v1 = vpop.f32.mrb[10].mxu1 }
  0xf4   :  { %v266_v2 = vpop.f32.mrb[11].mxu0  ;;  %v330_v3 = vpop.f32.mrb[11].mxu1  ;;  %v406_v10 = vmul.f32 %v543_v0, %v543_v0 }
  0xf5   :  { %v434_v4 = vadd.f32 %v433_v63, %v403_v62  ;;  %v366_v5 = vadd.f32 %v365_v61, %v266_v2  ;;  %v404_v6 = vmul.f32 %v266_v2, %v266_v2 }
  0xf7   :  { %v367_v8 = vadd.f32 %v542_v56, %v366_v5  ;;  %v435_v9 = vadd.f32 %v434_v4, %v404_v6  ;;  %v416_v56 = vmul.f32 %v696_v47, %v696_v47  ;;  %v420_v5 = vmul.f32 %v330_v3, %v330_v3 }
  0xf9   :  { %v436_v11 = vadd.f32 %v435_v9, %v405_v7  ;;  %v546_v12 = vpop.f32.mrb[12].mxu0  ;;  %v368_v13 = vadd.f32 %v543_v0, %v367_v8  ;;  %v562_v14 = vpop.f32.mrb[12].mxu1 }
  0xfa   :  { %v279_v15 = vpop.f32.mrb[13].mxu0  ;;  %v343_v16 = vpop.f32.mrb[13].mxu1  ;;  %v409_v31 = vmul.f32 %v546_v12, %v546_v12 }
  0xfb   :  { %v369_v17 = vadd.f32 %v368_v13, %v279_v15  ;;  %v407_v18 = vmul.f32 %v279_v15, %v279_v15  ;;  %v437_v19 = vadd.f32 %v436_v11, %v406_v10  ;;  %v547_v20 = vpop.f32.mrb[14].mxu0  ;;  %v563_v22 = vpop.f32.mrb[14].mxu1  ;;  %v423_v10 = vmul.f32 %v343_v16, %v343_v16 }
  0xfc   :  { %v282_v24 = vpop.f32.mrb[15].mxu0  ;;  %v346_v26 = vpop.f32.mrb[15].mxu1  ;;  %v410_v34 = vmul.f32 %v547_v20, %v547_v20  ;;  %v425_v15 = vmul.f32 %v562_v14, %v562_v14 }
  0xfd   :  { %v438_v28 = vadd.f32 %v437_v19, %v407_v18  ;;  %v370_v29 = vadd.f32 %v369_v17, %v282_v24  ;;  %v408_v30 = vmul.f32 %v282_v24, %v282_v24  ;;  %v424_v13 = vmul.f32 %v346_v26, %v346_v26 }
  0xfe   :  { %v426_v18 = vmul.f32 %v563_v22, %v563_v22 }
  0xff   :  { %v371_v32 = vadd.f32 %v546_v12, %v370_v29  ;;  %v439_v33 = vadd.f32 %v438_v28, %v408_v30 }
 0x101   :  { %v440_v35 = vadd.f32 %v439_v33, %v409_v31  ;;  %v372_v36 = vadd.f32 %v547_v20, %v371_v32 }
 0x103   :  { %v373_v39 = vadd.f32 %v372_v36, %v684_v23  ;;  %v441_v41 = vadd.f32 %v440_v35, %v410_v34  ;;  %v415_v23 = vmul.f32 %v692_v40, %v692_v40 }
 0x105   :  { %v442_v42 = vadd.f32 %v441_v41, %v411_v37  ;;  %v374_v43 = vadd.f32 %v373_v39, %v688_v27 }
 0x107   :  { %v375_v48 = vadd.f32 %v682_v21, %v374_v43  ;;  %v443_v49 = vadd.f32 %v442_v42, %v412_v44  ;;  %v417_v21 = vmul.f32 %v690_v38, %v690_v38 }
 0x109   :  { %v444_v51 = vadd.f32 %v443_v49, %v413_v46  ;;  %v376_v52 = vadd.f32 %v686_v25, %v375_v48  ;;  %v418_v25 = vmul.f32 %v694_v45, %v694_v45 }
 0x10b   :  { %v377_v53 = vadd.f32 %v376_v52, %v692_v40  ;;  %v445_v54 = vadd.f32 %v444_v51, %v414_v50  ;;  %v419_v40 = vmul.f32 %v327_v60, %v327_v60 }
 0x10d   :  { %v446_v55 = vadd.f32 %v445_v54, %v415_v23  ;;  %v378_v27 = vadd.f32 %v377_v53, %v696_v47  ;;  %v421_v47 = vmul.f32 %v698_v58, %v698_v58 }
 0x10f   :  { %v379_v57 = vadd.f32 %v690_v38, %v378_v27  ;;  %v447_v59 = vadd.f32 %v446_v55, %v416_v56  ;;  %v422_v38 = vmul.f32 %v700_v1, %v700_v1 }
 0x111   :  { %v448_v61 = vadd.f32 %v447_v59, %v417_v21  ;;  %v380_v62 = vadd.f32 %v694_v45, %v379_v57 }
 0x113   :  { %v381_v63 = vadd.f32 %v380_v62, %v327_v60  ;;  %v449_v0 = vadd.f32 %v448_v61, %v418_v25 }
 0x115   :  { %v450_v2 = vadd.f32 %v449_v0, %v419_v40  ;;  %v382_v4 = vadd.f32 %v381_v63, %v330_v3 }
 0x117   :  { %v383_v6 = vadd.f32 %v698_v58, %v382_v4  ;;  %v451_v7 = vadd.f32 %v450_v2, %v420_v5 }
 0x119   :  { %v452_v8 = vadd.f32 %v451_v7, %v421_v47  ;;  %v384_v9 = vadd.f32 %v700_v1, %v383_v6 }
 0x11b   :  { %v385_v45 = vadd.f32 %v384_v9, %v343_v16  ;;  %v453_v11 = vadd.f32 %v452_v8, %v422_v38 }
 0x11d   :  { %v454_v60 = vadd.f32 %v453_v11, %v423_v10  ;;  %v386_v12 = vadd.f32 %v385_v45, %v346_v26 }
 0x11f   :  { %v387_v3 = vadd.f32 %v562_v14, %v386_v12  ;;  %v455_v17 = vadd.f32 %v454_v60, %v424_v13 }
 0x121   :  { %v388_v19 = vadd.f32 %v563_v22, %v387_v3  ;;  %v456_v20 = vadd.f32 %v455_v17, %v425_v15 }
 0x123   :  { %v389_v58 = vrot.slane %v388_v19, 4  ;;  %v457_v24 = vadd.f32 %v456_v20, %v426_v18 }
 0x125   :  { %v390_v28 = vadd.f32 %v389_v58, %v388_v19  ;;  %v458_v29 = vrot.slane %v457_v24, 4 }
 0x127   :  { %v391_v30 = vrot.slane %v390_v28, 2  ;;  %v459_v31 = vadd.f32 %v458_v29, %v457_v24 }
 0x129   :  { %v392_v32 = vadd.f32 %v391_v30, %v390_v28  ;;  %v460_v1 = vrot.slane %v459_v31, 2 }
 0x12b   :  { %v393_v33 = vrot.slane %v392_v32, 1  ;;  %v461_v16 = vadd.f32 %v460_v1, %v459_v31 }
 0x12d   :  { %v462_v34 = vrot.slane %v461_v16, 1  ;;  %v394_v35 = vadd.f32 %v393_v33, %v392_v32 }
 0x12f   :  { %v463_v26 = vadd.f32 %v462_v34, %v461_v16 }
 0x131   :  { %v465_v36 = vsel %vm464_vm2, %v394_v35, %v463_v26 }
 0x132   :  { %v466_v14 = vsel %vm193_vm1, %v465_v36, 0.0 }
 0x133   :  { %467 = vst [vmem:[%s738_s2] sm:$0xff] %v466_v14 }

</bundles_post_ra>
